<compile_context>
chip_gen: v7x
topology: tpu7x:2x2x1
jax: 0.10.0
libtpu: 0.0.40
codegen_flags: <defaults>
</compile_context>

<pallas_src>
import numpy as np

import jax
import jax.numpy as jnp
from jax import lax
from jax.experimental import pallas as pl
from jax.experimental.pallas import tpu as pltpu


# ----------------------------------------------------------------------------
# Fused kernel factory (static shapes captured by closure)
# ----------------------------------------------------------------------------
def _make_kernel(batch, length, channel, n_layers):
    # Conv1d(k=3, padding=1, stride=2): for even lengths L_out = L/2.
    assert length % (2 ** n_layers) == 0, "time length must stay even per layer"
    lens = [length // (2 ** (i + 1)) for i in range(n_layers)]

    def kernel(x_ref, convw_ref, bn_ref, fc_ref, txt_ref, txtw_ref,
               out_ref, *h_refs):

        def conv_bn_relu(in_ref, l_out, layer):
            rows = batch * l_out
            # Stride-2 tap selection directly from the ref (no gather matmuls).
            even = in_ref[pl.ds(0, rows, stride=2), :]   # input pos 2t    (tap 1)
            odd = in_ref[pl.ds(1, rows, stride=2), :]    # input pos 2t+1  (tap 2)
            # tap 0 = input pos 2t-1 = previous odd row; zero at each batch's t=0
            prev = jnp.concatenate(
                [jnp.zeros((1, channel), jnp.float32), odd[:rows - 1, :]],
                axis=0)
            t_idx = lax.broadcasted_iota(jnp.int32, (rows, 1), 0)
            prev = jnp.where(t_idx % l_out == 0, 0.0, prev)
            # One fused GEMM per layer: [rows, 3C] @ [3C, C]   (f32, tiny K)
            xcat = jnp.concatenate([prev, even, odd], axis=-1)
            y = jnp.dot(xcat, convw_ref[layer],
                        preferred_element_type=jnp.float32)
            # Conv bias omitted: exactly cancelled by training-mode BN mean.
            # BatchNorm1d (training mode): per-channel stats over (batch, time),
            # biased variance, eps = 1e-5.
            mean = jnp.mean(y, axis=0, keepdims=True)
            var = jnp.mean(jnp.square(y - mean), axis=0, keepdims=True)
            z = (y - mean) * lax.rsqrt(var + 1e-5)
            z = z * bn_ref[layer, 0:1, :] + bn_ref[layer, 1:2, :]
            return jnp.maximum(z, 0.0)                   # ReLU

        # --- ECG encoder: layer intermediates stay in VMEM scratch ----------
        src = x_ref
        for i in range(n_layers):
            h_refs[i][...] = conv_bn_relu(src, lens[i], i)
            src = h_refs[i]

        # --- torch.mean(x, dim=-1): strided row reads + VPU adds ------------
        l_last = lens[-1]
        pooled = src[pl.ds(0, batch, stride=l_last), :]
        for tt in range(1, l_last):
            pooled = pooled + src[pl.ds(tt, batch, stride=l_last), :]
        pooled = pooled * (1.0 / float(l_last))          # [B, C]

        # --- fc(C -> 128) + F.normalize(p=2, dim=-1) via fused rsqrt (EUP) ---
        fc_w = fc_ref[0:channel, :]
        fc_b = fc_ref[channel:channel + 1, :]
        txt_b = fc_ref[channel + 1:channel + 2, :]
        e = jnp.dot(pooled, fc_w, preferred_element_type=jnp.float32) + fc_b
        e_n = e * lax.rsqrt(
            jnp.maximum(jnp.sum(e * e, axis=-1, keepdims=True), 1e-24))

        # --- text predictor Linear(768 -> 128): bf16 MXU operands, f32 acc ---
        tfeat = jnp.dot(txt_ref[...], txtw_ref[...],
                        preferred_element_type=jnp.float32) + txt_b
        t_n = tfeat * lax.rsqrt(
            jnp.maximum(jnp.sum(tfeat * tfeat, axis=-1, keepdims=True), 1e-24))

        # --- ecg_feature @ text_feature.T (contract on feature dim) ----------
        out_ref[...] = lax.dot_general(
            e_n, t_n, (((1,), (1,)), ((), ())),
            preferred_element_type=jnp.float32)

    return kernel, lens


# ----------------------------------------------------------------------------
# Model wrapper (single fused pallas_call, no grid: working set < 1 MiB)
# ----------------------------------------------------------------------------
def clip_ecg_forward(ecg, text_pooled, params):
    b, c_in, l = ecg.shape
    n_layers, three_c, channel = params["conv_w"].shape
    num_classes = params["fc_pack"].shape[1]
    bt, bert_hidden = text_pooled.shape

    # One-time layout plumbing: NCL -> channels-last rows [B*L, C]; pad the
    # 12 ECG leads to the 16-channel slab width so every layer shares the same
    # [3C, C] weight shape (padded channels are zero -> conv output unchanged).
    x_rows = jnp.transpose(ecg, (0, 2, 1)).reshape(b * l, c_in)
    if c_in < channel:
        x_rows = jnp.pad(x_rows, ((0, 0), (0, channel - c_in)))

    kernel, lens = _make_kernel(b, l, channel, n_layers)

    args = (x_rows, params["conv_w"], params["bn_p"], params["fc_pack"],
            text_pooled.astype(jnp.bfloat16), params["txt_w"])

    vmem = pl.BlockSpec(memory_space=pltpu.MemorySpace.VMEM)

    conv_flops = sum(2 * b * lo * three_c * channel for lo in lens)
    flops = (conv_flops + 2 * b * channel * num_classes
             + 2 * bt * bert_hidden * num_classes + 2 * b * num_classes * bt)
    bytes_accessed = sum(a.size * a.dtype.itemsize for a in args) + b * bt * 4
    cost = pl.CostEstimate(flops=flops,
                           transcendentals=n_layers * channel + b + bt,
                           bytes_accessed=bytes_accessed)

    return pl.pallas_call(
        kernel,
        out_shape=jax.ShapeDtypeStruct((b, bt), jnp.float32),
        in_specs=[vmem] * len(args),
        out_specs=vmem,
        scratch_shapes=[pltpu.VMEM((b * lo, channel), jnp.float32)
                        for lo in lens],
        cost_estimate=cost,
    )(*args)


# ----------------------------------------------------------------------------
# Deterministic parameter init (shapes from simple_CNN / clinicalBERT.__init__)
# ----------------------------------------------------------------------------
def init_params(key, init_channels=12, channel=16, layers=3, num_classes=128,
                bert_hidden=768, k=3):
    keys = jax.random.split(key, layers + 2)
    conv_w, bn_p = [], []
    cin = init_channels
    for i in range(layers):
        # Per-tap layout [K, Cin, Cout]; to import PyTorch Conv1d weights
        # [Cout, Cin, K] use w_jax = w_torch.transpose(2, 1, 0).  Layer-1 input
        # channels are zero-padded 12 -> 16 to match the padded ECG rows.
        w = jax.random.normal(keys[i], (k, cin, channel), jnp.float32) * (
            1.0 / float(np.sqrt(cin * k)))
        if cin < channel:
            w = jnp.pad(w, ((0, 0), (0, channel - cin), (0, 0)))
        conv_w.append(w.reshape(k * channel, channel))   # rows: tap0|tap1|tap2
        bn_p.append(jnp.stack([jnp.ones((channel,), jnp.float32),    # BN weight
                               jnp.zeros((channel,), jnp.float32)],  # BN bias
                              axis=0))
        cin = channel
    fc_w = jax.random.normal(keys[-2], (channel, num_classes), jnp.float32) * (
        1.0 / float(np.sqrt(channel)))
    fc_b = jnp.zeros((1, num_classes), jnp.float32)
    txt_w = (jax.random.normal(keys[-1], (bert_hidden, num_classes),
                               jnp.float32)
             * (1.0 / float(np.sqrt(bert_hidden)))).astype(jnp.bfloat16)
    txt_b = jnp.zeros((1, num_classes), jnp.float32)
    return {
        "conv_w": jnp.stack(conv_w, axis=0),                       # [L, 3C, C]
        "bn_p": jnp.stack(bn_p, axis=0),                           # [L, 2, C]
        "fc_pack": jnp.concatenate([fc_w, fc_b, txt_b], axis=0),   # [C+2, 128]
        "txt_w": txt_w,                                            # [768, 128] bf16
    }


if __name__ == "__main__":
    key = jax.random.PRNGKey(0)
    kp, ke, kt = jax.random.split(key, 3)

    params = init_params(kp)

    # ecg: [B=2, C=12 leads, L=16 samples]  (NCL, PyTorch Conv1d layout)
    ecg = jax.random.normal(ke, (2, 12, 16), jnp.float32)
    # text branch input: BERT pooler_output stand-in [Bt=2, 768]
    text_pooled = jax.random.normal(kt, (2, 768), jnp.float32)

    fwd = jax.jit(lambda e, t: clip_ecg_forward(e, t, params))
    logits = fwd(ecg, text_pooled)
    jax.block_until_ready(logits)

    assert logits.shape == (2, 2) and logits.dtype == jnp.float32
    assert bool(jnp.all(jnp.isfinite(logits)))
    print("KERNEL_OK")
</pallas_src>

<mosaic_0001>
module attributes {stable_mosaic.version = 11 : i64} {
  func.func @kernel(%arg0: memref<32x16xf32, #tpu.memory_space<vmem>>, %arg1: memref<3x48x16xf32, #tpu.memory_space<vmem>>, %arg2: memref<3x2x16xf32, #tpu.memory_space<vmem>>, %arg3: memref<18x128xf32, #tpu.memory_space<vmem>>, %arg4: memref<2x768xbf16, #tpu.memory_space<vmem>>, %arg5: memref<768x128xbf16, #tpu.memory_space<vmem>>, %arg6: memref<2x2xf32, #tpu.memory_space<vmem>>, %arg7: memref<16x16xf32, #tpu.memory_space<vmem>>, %arg8: memref<8x16xf32, #tpu.memory_space<vmem>>, %arg9: memref<4x16xf32, #tpu.memory_space<vmem>>) attributes {dimension_semantics = [], scalar_prefetch = 0 : i64, scratch_operands = 3 : i64, tpu.core_type = #tpu.core_type<tc>} {
    %c0 = arith.constant 0 : index
    %c0_0 = arith.constant 0 : index
    %0 = tpu.strided_load %arg0[%c0, %c0_0] {strides = array<i32: 2, 1>} : memref<32x16xf32, #tpu.memory_space<vmem>>, vector<16x16xf32>
    %c1 = arith.constant 1 : index
    %c0_1 = arith.constant 0 : index
    %1 = tpu.strided_load %arg0[%c1, %c0_1] {strides = array<i32: 2, 1>} : memref<32x16xf32, #tpu.memory_space<vmem>>, vector<16x16xf32>
    %cst = arith.constant 0.000000e+00 : f32
    %2 = vector.broadcast %cst : f32 to vector<1x16xf32>
    %3 = vector.extract_strided_slice %1 {offsets = [0, 0], sizes = [15, 16], strides = [1, 1]} : vector<16x16xf32> to vector<15x16xf32>
    %4 = tpu.concatenate %2, %3 in 0 : vector<1x16xf32>, vector<15x16xf32> -> vector<16x16xf32>
    %5 = tpu.iota {dimensions = array<i32: 0>} : vector<16x1xi32>
    %c8_i32 = arith.constant 8 : i32
    %c0_i32 = arith.constant 0 : i32
    %6 = arith.cmpi eq, %c8_i32, %c0_i32 : i32
    %c1_i32 = arith.constant 1 : i32
    %7 = arith.select %6, %c1_i32, %c8_i32 : i32
    %8 = vector.broadcast %7 : i32 to vector<16x1xi32>
    %9 = arith.remsi %5, %8 : vector<16x1xi32>
    %c0_i32_2 = arith.constant 0 : i32
    %10 = vector.broadcast %c0_i32_2 : i32 to vector<16x1xi32>
    %11 = arith.cmpi ne, %9, %10 : vector<16x1xi32>
    %c0_i32_3 = arith.constant 0 : i32
    %12 = vector.broadcast %c0_i32_3 : i32 to vector<16x1xi32>
    %13 = arith.cmpi slt, %9, %12 : vector<16x1xi32>
    %c0_i32_4 = arith.constant 0 : i32
    %14 = arith.cmpi slt, %7, %c0_i32_4 : i32
    %15 = vector.broadcast %14 : i1 to vector<16x1xi1>
    %16 = vector.broadcast %15 : vector<16x1xi1> to vector<16x1xi1>
    %17 = arith.xori %13, %16 : vector<16x1xi1>
    %18 = arith.andi %17, %11 : vector<16x1xi1>
    %19 = vector.broadcast %7 : i32 to vector<16x1xi32>
    %20 = arith.addi %9, %19 : vector<16x1xi32>
    %21 = arith.select %18, %20, %9 : vector<16x1xi1>, vector<16x1xi32>
    %c0_i32_5 = arith.constant 0 : i32
    %22 = vector.broadcast %c0_i32_5 : i32 to vector<16x1xi32>
    %23 = arith.cmpi eq, %21, %22 : vector<16x1xi32>
    %cst_6 = arith.constant 0.000000e+00 : f32
    %24 = vector.shape_cast %23 : vector<16x1xi1> to vector<16x1xi1>
    %25 = vector.broadcast %24 : vector<16x1xi1> to vector<16x16xi1>
    %26 = vector.broadcast %cst_6 : f32 to vector<16x16xf32>
    %27 = arith.select %25, %26, %4 : vector<16x16xi1>, vector<16x16xf32>
    %28 = tpu.concatenate %27, %0, %1 in 1 : vector<16x16xf32>, vector<16x16xf32>, vector<16x16xf32> -> vector<16x48xf32>
    %c0_7 = arith.constant 0 : index
    %c0_8 = arith.constant 0 : index
    %c0_9 = arith.constant 0 : index
    %29 = vector.load %arg1[%c0_7, %c0_8, %c0_9] : memref<3x48x16xf32, #tpu.memory_space<vmem>>, vector<1x48x16xf32>
    %30 = vector.shape_cast %29 : vector<1x48x16xf32> to vector<48x16xf32>
    %cst_10 = arith.constant dense<0.000000e+00> : vector<16x16xf32>
    %31 = tpu.matmul %28, %30, %cst_10 {dimension_numbers = #tpu.dot_dimension_numbers<[1], [0], [0], [1], [0, 0, 1, 1], [], []>} : vector<16x48xf32>, vector<48x16xf32>, vector<16x16xf32> -> vector<16x16xf32>
    %cst_11 = arith.constant dense<0.000000e+00> : vector<16xf32>
    %32 = vector.multi_reduction <add>, %31, %cst_11 [0] : vector<16x16xf32> to vector<16xf32>
    %33 = vector.shape_cast %32 : vector<16xf32> to vector<1x16xf32>
    %cst_12 = arith.constant 1.600000e+01 : f32
    %34 = vector.broadcast %cst_12 : f32 to vector<1x16xf32>
    %35 = arith.divf %33, %34 : vector<1x16xf32>
    %36 = vector.broadcast %35 : vector<1x16xf32> to vector<16x16xf32>
    %37 = arith.subf %31, %36 : vector<16x16xf32>
    %38 = arith.mulf %37, %37 : vector<16x16xf32>
    %cst_13 = arith.constant dense<0.000000e+00> : vector<16xf32>
    %39 = vector.multi_reduction <add>, %38, %cst_13 [0] : vector<16x16xf32> to vector<16xf32>
    %40 = vector.shape_cast %39 : vector<16xf32> to vector<1x16xf32>
    %cst_14 = arith.constant 1.600000e+01 : f32
    %41 = vector.broadcast %cst_14 : f32 to vector<1x16xf32>
    %42 = arith.divf %40, %41 : vector<1x16xf32>
    %43 = vector.broadcast %35 : vector<1x16xf32> to vector<16x16xf32>
    %44 = arith.subf %31, %43 : vector<16x16xf32>
    %cst_15 = arith.constant 9.99999974E-6 : f32
    %45 = vector.broadcast %cst_15 : f32 to vector<1x16xf32>
    %46 = arith.addf %42, %45 : vector<1x16xf32>
    %47 = math.rsqrt %46 : vector<1x16xf32>
    %48 = vector.broadcast %47 : vector<1x16xf32> to vector<16x16xf32>
    %49 = arith.mulf %44, %48 : vector<16x16xf32>
    %c0_16 = arith.constant 0 : index
    %c0_17 = arith.constant 0 : index
    %c0_18 = arith.constant 0 : index
    %50 = vector.load %arg2[%c0_16, %c0_17, %c0_18] : memref<3x2x16xf32, #tpu.memory_space<vmem>>, vector<1x1x16xf32>
    %51 = vector.shape_cast %50 : vector<1x1x16xf32> to vector<1x16xf32>
    %52 = vector.broadcast %51 : vector<1x16xf32> to vector<16x16xf32>
    %53 = arith.mulf %49, %52 : vector<16x16xf32>
    %c0_19 = arith.constant 0 : index
    %c1_20 = arith.constant 1 : index
    %c0_21 = arith.constant 0 : index
    %54 = vector.load %arg2[%c0_19, %c1_20, %c0_21] : memref<3x2x16xf32, #tpu.memory_space<vmem>>, vector<1x1x16xf32>
    %55 = vector.shape_cast %54 : vector<1x1x16xf32> to vector<1x16xf32>
    %56 = vector.broadcast %55 : vector<1x16xf32> to vector<16x16xf32>
    %57 = arith.addf %53, %56 : vector<16x16xf32>
    %cst_22 = arith.constant 0.000000e+00 : f32
    %58 = vector.broadcast %cst_22 : f32 to vector<16x16xf32>
    %59 = arith.maximumf %57, %58 : vector<16x16xf32>
    %c0_23 = arith.constant 0 : index
    %c0_24 = arith.constant 0 : index
    %60 = vector.load %arg7[%c0_23, %c0_24] : memref<16x16xf32, #tpu.memory_space<vmem>>, vector<16x16xf32>
    tpu.vector_store %arg7[%c0_23, %c0_24], %59 {strides = array<i32>} : memref<16x16xf32, #tpu.memory_space<vmem>>, vector<16x16xf32>,
    %c0_25 = arith.constant 0 : index
    %c0_26 = arith.constant 0 : index
    %61 = tpu.strided_load %arg7[%c0_25, %c0_26] {strides = array<i32: 2, 1>} : memref<16x16xf32, #tpu.memory_space<vmem>>, vector<8x16xf32>
    %c1_27 = arith.constant 1 : index
    %c0_28 = arith.constant 0 : index
    %62 = tpu.strided_load %arg7[%c1_27, %c0_28] {strides = array<i32: 2, 1>} : memref<16x16xf32, #tpu.memory_space<vmem>>, vector<8x16xf32>
    %cst_29 = arith.constant 0.000000e+00 : f32
    %63 = vector.broadcast %cst_29 : f32 to vector<1x16xf32>
    %64 = vector.extract_strided_slice %62 {offsets = [0, 0], sizes = [7, 16], strides = [1, 1]} : vector<8x16xf32> to vector<7x16xf32>
    %65 = tpu.concatenate %63, %64 in 0 : vector<1x16xf32>, vector<7x16xf32> -> vector<8x16xf32>
    %66 = tpu.iota {dimensions = array<i32: 0>} : vector<8x1xi32>
    %c4_i32 = arith.constant 4 : i32
    %c0_i32_30 = arith.constant 0 : i32
    %67 = arith.cmpi eq, %c4_i32, %c0_i32_30 : i32
    %c1_i32_31 = arith.constant 1 : i32
    %68 = arith.select %67, %c1_i32_31, %c4_i32 : i32
    %69 = vector.broadcast %68 : i32 to vector<8x1xi32>
    %70 = arith.remsi %66, %69 : vector<8x1xi32>
    %c0_i32_32 = arith.constant 0 : i32
    %71 = vector.broadcast %c0_i32_32 : i32 to vector<8x1xi32>
    %72 = arith.cmpi ne, %70, %71 : vector<8x1xi32>
    %c0_i32_33 = arith.constant 0 : i32
    %73 = vector.broadcast %c0_i32_33 : i32 to vector<8x1xi32>
    %74 = arith.cmpi slt, %70, %73 : vector<8x1xi32>
    %c0_i32_34 = arith.constant 0 : i32
    %75 = arith.cmpi slt, %68, %c0_i32_34 : i32
    %76 = vector.broadcast %75 : i1 to vector<8x1xi1>
    %77 = vector.broadcast %76 : vector<8x1xi1> to vector<8x1xi1>
    %78 = arith.xori %74, %77 : vector<8x1xi1>
    %79 = arith.andi %78, %72 : vector<8x1xi1>
    %80 = vector.broadcast %68 : i32 to vector<8x1xi32>
    %81 = arith.addi %70, %80 : vector<8x1xi32>
    %82 = arith.select %79, %81, %70 : vector<8x1xi1>, vector<8x1xi32>
    %c0_i32_35 = arith.constant 0 : i32
    %83 = vector.broadcast %c0_i32_35 : i32 to vector<8x1xi32>
    %84 = arith.cmpi eq, %82, %83 : vector<8x1xi32>
    %cst_36 = arith.constant 0.000000e+00 : f32
    %85 = vector.shape_cast %84 : vector<8x1xi1> to vector<8x1xi1>
    %86 = vector.broadcast %85 : vector<8x1xi1> to vector<8x16xi1>
    %87 = vector.broadcast %cst_36 : f32 to vector<8x16xf32>
    %88 = arith.select %86, %87, %65 : vector<8x16xi1>, vector<8x16xf32>
    %89 = tpu.concatenate %88, %61, %62 in 1 : vector<8x16xf32>, vector<8x16xf32>, vector<8x16xf32> -> vector<8x48xf32>
    %c1_37 = arith.constant 1 : index
    %c0_38 = arith.constant 0 : index
    %c0_39 = arith.constant 0 : index
    %90 = vector.load %arg1[%c1_37, %c0_38, %c0_39] : memref<3x48x16xf32, #tpu.memory_space<vmem>>, vector<1x48x16xf32>
    %91 = vector.shape_cast %90 : vector<1x48x16xf32> to vector<48x16xf32>
    %cst_40 = arith.constant dense<0.000000e+00> : vector<8x16xf32>
    %92 = tpu.matmul %89, %91, %cst_40 {dimension_numbers = #tpu.dot_dimension_numbers<[1], [0], [0], [1], [0, 0, 1, 1], [], []>} : vector<8x48xf32>, vector<48x16xf32>, vector<8x16xf32> -> vector<8x16xf32>
    %cst_41 = arith.constant dense<0.000000e+00> : vector<16xf32>
    %93 = vector.multi_reduction <add>, %92, %cst_41 [0] : vector<8x16xf32> to vector<16xf32>
    %94 = vector.shape_cast %93 : vector<16xf32> to vector<1x16xf32>
    %cst_42 = arith.constant 8.000000e+00 : f32
    %95 = vector.broadcast %cst_42 : f32 to vector<1x16xf32>
    %96 = arith.divf %94, %95 : vector<1x16xf32>
    %97 = vector.broadcast %96 : vector<1x16xf32> to vector<8x16xf32>
    %98 = arith.subf %92, %97 : vector<8x16xf32>
    %99 = arith.mulf %98, %98 : vector<8x16xf32>
    %cst_43 = arith.constant dense<0.000000e+00> : vector<16xf32>
    %100 = vector.multi_reduction <add>, %99, %cst_43 [0] : vector<8x16xf32> to vector<16xf32>
    %101 = vector.shape_cast %100 : vector<16xf32> to vector<1x16xf32>
    %cst_44 = arith.constant 8.000000e+00 : f32
    %102 = vector.broadcast %cst_44 : f32 to vector<1x16xf32>
    %103 = arith.divf %101, %102 : vector<1x16xf32>
    %104 = vector.broadcast %96 : vector<1x16xf32> to vector<8x16xf32>
    %105 = arith.subf %92, %104 : vector<8x16xf32>
    %cst_45 = arith.constant 9.99999974E-6 : f32
    %106 = vector.broadcast %cst_45 : f32 to vector<1x16xf32>
    %107 = arith.addf %103, %106 : vector<1x16xf32>
    %108 = math.rsqrt %107 : vector<1x16xf32>
    %109 = vector.broadcast %108 : vector<1x16xf32> to vector<8x16xf32>
    %110 = arith.mulf %105, %109 : vector<8x16xf32>
    %c1_46 = arith.constant 1 : index
    %c0_47 = arith.constant 0 : index
    %c0_48 = arith.constant 0 : index
    %111 = vector.load %arg2[%c1_46, %c0_47, %c0_48] : memref<3x2x16xf32, #tpu.memory_space<vmem>>, vector<1x1x16xf32>
    %112 = vector.shape_cast %111 : vector<1x1x16xf32> to vector<1x16xf32>
    %113 = vector.broadcast %112 : vector<1x16xf32> to vector<8x16xf32>
    %114 = arith.mulf %110, %113 : vector<8x16xf32>
    %c1_49 = arith.constant 1 : index
    %c1_50 = arith.constant 1 : index
    %c0_51 = arith.constant 0 : index
    %115 = vector.load %arg2[%c1_49, %c1_50, %c0_51] : memref<3x2x16xf32, #tpu.memory_space<vmem>>, vector<1x1x16xf32>
    %116 = vector.shape_cast %115 : vector<1x1x16xf32> to vector<1x16xf32>
    %117 = vector.broadcast %116 : vector<1x16xf32> to vector<8x16xf32>
    %118 = arith.addf %114, %117 : vector<8x16xf32>
    %cst_52 = arith.constant 0.000000e+00 : f32
    %119 = vector.broadcast %cst_52 : f32 to vector<8x16xf32>
    %120 = arith.maximumf %118, %119 : vector<8x16xf32>
    %c0_53 = arith.constant 0 : index
    %c0_54 = arith.constant 0 : index
    %121 = vector.load %arg8[%c0_53, %c0_54] : memref<8x16xf32, #tpu.memory_space<vmem>>, vector<8x16xf32>
    tpu.vector_store %arg8[%c0_53, %c0_54], %120 {strides = array<i32>} : memref<8x16xf32, #tpu.memory_space<vmem>>, vector<8x16xf32>,
    %c0_55 = arith.constant 0 : index
    %c0_56 = arith.constant 0 : index
    %122 = tpu.strided_load %arg8[%c0_55, %c0_56] {strides = array<i32: 2, 1>} : memref<8x16xf32, #tpu.memory_space<vmem>>, vector<4x16xf32>
    %c1_57 = arith.constant 1 : index
    %c0_58 = arith.constant 0 : index
    %123 = tpu.strided_load %arg8[%c1_57, %c0_58] {strides = array<i32: 2, 1>} : memref<8x16xf32, #tpu.memory_space<vmem>>, vector<4x16xf32>
    %cst_59 = arith.constant 0.000000e+00 : f32
    %124 = vector.broadcast %cst_59 : f32 to vector<1x16xf32>
    %125 = vector.extract_strided_slice %123 {offsets = [0, 0], sizes = [3, 16], strides = [1, 1]} : vector<4x16xf32> to vector<3x16xf32>
    %126 = tpu.concatenate %124, %125 in 0 : vector<1x16xf32>, vector<3x16xf32> -> vector<4x16xf32>
    %127 = tpu.iota {dimensions = array<i32: 0>} : vector<4x1xi32>
    %c2_i32 = arith.constant 2 : i32
    %c0_i32_60 = arith.constant 0 : i32
    %128 = arith.cmpi eq, %c2_i32, %c0_i32_60 : i32
    %c1_i32_61 = arith.constant 1 : i32
    %129 = arith.select %128, %c1_i32_61, %c2_i32 : i32
    %130 = vector.broadcast %129 : i32 to vector<4x1xi32>
    %131 = arith.remsi %127, %130 : vector<4x1xi32>
    %c0_i32_62 = arith.constant 0 : i32
    %132 = vector.broadcast %c0_i32_62 : i32 to vector<4x1xi32>
    %133 = arith.cmpi ne, %131, %132 : vector<4x1xi32>
    %c0_i32_63 = arith.constant 0 : i32
    %134 = vector.broadcast %c0_i32_63 : i32 to vector<4x1xi32>
    %135 = arith.cmpi slt, %131, %134 : vector<4x1xi32>
    %c0_i32_64 = arith.constant 0 : i32
    %136 = arith.cmpi slt, %129, %c0_i32_64 : i32
    %137 = vector.broadcast %136 : i1 to vector<4x1xi1>
    %138 = vector.broadcast %137 : vector<4x1xi1> to vector<4x1xi1>
    %139 = arith.xori %135, %138 : vector<4x1xi1>
    %140 = arith.andi %139, %133 : vector<4x1xi1>
    %141 = vector.broadcast %129 : i32 to vector<4x1xi32>
    %142 = arith.addi %131, %141 : vector<4x1xi32>
    %143 = arith.select %140, %142, %131 : vector<4x1xi1>, vector<4x1xi32>
    %c0_i32_65 = arith.constant 0 : i32
    %144 = vector.broadcast %c0_i32_65 : i32 to vector<4x1xi32>
    %145 = arith.cmpi eq, %143, %144 : vector<4x1xi32>
    %cst_66 = arith.constant 0.000000e+00 : f32
    %146 = vector.shape_cast %145 : vector<4x1xi1> to vector<4x1xi1>
    %147 = vector.broadcast %146 : vector<4x1xi1> to vector<4x16xi1>
    %148 = vector.broadcast %cst_66 : f32 to vector<4x16xf32>
    %149 = arith.select %147, %148, %126 : vector<4x16xi1>, vector<4x16xf32>
    %150 = tpu.concatenate %149, %122, %123 in 1 : vector<4x16xf32>, vector<4x16xf32>, vector<4x16xf32> -> vector<4x48xf32>
    %c2 = arith.constant 2 : index
    %c0_67 = arith.constant 0 : index
    %c0_68 = arith.constant 0 : index
    %151 = vector.load %arg1[%c2, %c0_67, %c0_68] : memref<3x48x16xf32, #tpu.memory_space<vmem>>, vector<1x48x16xf32>
    %152 = vector.shape_cast %151 : vector<1x48x16xf32> to vector<48x16xf32>
    %cst_69 = arith.constant dense<0.000000e+00> : vector<4x16xf32>
    %153 = tpu.matmul %150, %152, %cst_69 {dimension_numbers = #tpu.dot_dimension_numbers<[1], [0], [0], [1], [0, 0, 1, 1], [], []>} : vector<4x48xf32>, vector<48x16xf32>, vector<4x16xf32> -> vector<4x16xf32>
    %cst_70 = arith.constant dense<0.000000e+00> : vector<16xf32>
    %154 = vector.multi_reduction <add>, %153, %cst_70 [0] : vector<4x16xf32> to vector<16xf32>
    %155 = vector.shape_cast %154 : vector<16xf32> to vector<1x16xf32>
    %cst_71 = arith.constant 4.000000e+00 : f32
    %156 = vector.broadcast %cst_71 : f32 to vector<1x16xf32>
    %157 = arith.divf %155, %156 : vector<1x16xf32>
    %158 = vector.broadcast %157 : vector<1x16xf32> to vector<4x16xf32>
    %159 = arith.subf %153, %158 : vector<4x16xf32>
    %160 = arith.mulf %159, %159 : vector<4x16xf32>
    %cst_72 = arith.constant dense<0.000000e+00> : vector<16xf32>
    %161 = vector.multi_reduction <add>, %160, %cst_72 [0] : vector<4x16xf32> to vector<16xf32>
    %162 = vector.shape_cast %161 : vector<16xf32> to vector<1x16xf32>
    %cst_73 = arith.constant 4.000000e+00 : f32
    %163 = vector.broadcast %cst_73 : f32 to vector<1x16xf32>
    %164 = arith.divf %162, %163 : vector<1x16xf32>
    %165 = vector.broadcast %157 : vector<1x16xf32> to vector<4x16xf32>
    %166 = arith.subf %153, %165 : vector<4x16xf32>
    %cst_74 = arith.constant 9.99999974E-6 : f32
    %167 = vector.broadcast %cst_74 : f32 to vector<1x16xf32>
    %168 = arith.addf %164, %167 : vector<1x16xf32>
    %169 = math.rsqrt %168 : vector<1x16xf32>
    %170 = vector.broadcast %169 : vector<1x16xf32> to vector<4x16xf32>
    %171 = arith.mulf %166, %170 : vector<4x16xf32>
    %c2_75 = arith.constant 2 : index
    %c0_76 = arith.constant 0 : index
    %c0_77 = arith.constant 0 : index
    %172 = vector.load %arg2[%c2_75, %c0_76, %c0_77] : memref<3x2x16xf32, #tpu.memory_space<vmem>>, vector<1x1x16xf32>
    %173 = vector.shape_cast %172 : vector<1x1x16xf32> to vector<1x16xf32>
    %174 = vector.broadcast %173 : vector<1x16xf32> to vector<4x16xf32>
    %175 = arith.mulf %171, %174 : vector<4x16xf32>
    %c2_78 = arith.constant 2 : index
    %c1_79 = arith.constant 1 : index
    %c0_80 = arith.constant 0 : index
    %176 = vector.load %arg2[%c2_78, %c1_79, %c0_80] : memref<3x2x16xf32, #tpu.memory_space<vmem>>, vector<1x1x16xf32>
    %177 = vector.shape_cast %176 : vector<1x1x16xf32> to vector<1x16xf32>
    %178 = vector.broadcast %177 : vector<1x16xf32> to vector<4x16xf32>
    %179 = arith.addf %175, %178 : vector<4x16xf32>
    %cst_81 = arith.constant 0.000000e+00 : f32
    %180 = vector.broadcast %cst_81 : f32 to vector<4x16xf32>
    %181 = arith.maximumf %179, %180 : vector<4x16xf32>
    %c0_82 = arith.constant 0 : index
    %c0_83 = arith.constant 0 : index
    %182 = vector.load %arg9[%c0_82, %c0_83] : memref<4x16xf32, #tpu.memory_space<vmem>>, vector<4x16xf32>
    tpu.vector_store %arg9[%c0_82, %c0_83], %181 {strides = array<i32>} : memref<4x16xf32, #tpu.memory_space<vmem>>, vector<4x16xf32>,
    %c0_84 = arith.constant 0 : index
    %c0_85 = arith.constant 0 : index
    %183 = tpu.strided_load %arg9[%c0_84, %c0_85] {strides = array<i32: 2, 1>} : memref<4x16xf32, #tpu.memory_space<vmem>>, vector<2x16xf32>
    %c1_86 = arith.constant 1 : index
    %c0_87 = arith.constant 0 : index
    %184 = tpu.strided_load %arg9[%c1_86, %c0_87] {strides = array<i32: 2, 1>} : memref<4x16xf32, #tpu.memory_space<vmem>>, vector<2x16xf32>
    %185 = arith.addf %183, %184 : vector<2x16xf32>
    %cst_88 = arith.constant 5.000000e-01 : f32
    %186 = vector.broadcast %cst_88 : f32 to vector<2x16xf32>
    %187 = arith.mulf %185, %186 : vector<2x16xf32>
    %c0_89 = arith.constant 0 : index
    %c0_90 = arith.constant 0 : index
    %188 = vector.load %arg3[%c0_89, %c0_90] : memref<18x128xf32, #tpu.memory_space<vmem>>, vector<16x128xf32>
    %c16 = arith.constant 16 : index
    %c0_91 = arith.constant 0 : index
    %189 = vector.load %arg3[%c16, %c0_91] : memref<18x128xf32, #tpu.memory_space<vmem>>, vector<1x128xf32>
    %c17 = arith.constant 17 : index
    %c0_92 = arith.constant 0 : index
    %190 = vector.load %arg3[%c17, %c0_92] : memref<18x128xf32, #tpu.memory_space<vmem>>, vector<1x128xf32>
    %cst_93 = arith.constant dense<0.000000e+00> : vector<2x128xf32>
    %191 = tpu.matmul %187, %188, %cst_93 {dimension_numbers = #tpu.dot_dimension_numbers<[1], [0], [0], [1], [0, 0, 1, 1], [], []>} : vector<2x16xf32>, vector<16x128xf32>, vector<2x128xf32> -> vector<2x128xf32>
    %192 = vector.broadcast %189 : vector<1x128xf32> to vector<2x128xf32>
    %193 = arith.addf %191, %192 : vector<2x128xf32>
    %194 = arith.mulf %193, %193 : vector<2x128xf32>
    %cst_94 = arith.constant dense<0.000000e+00> : vector<2xf32>
    %195 = vector.multi_reduction <add>, %194, %cst_94 [1] : vector<2x128xf32> to vector<2xf32>
    %196 = vector.shape_cast %195 : vector<2xf32> to vector<2x1xf32>
    %cst_95 = arith.constant 1.000000e-24 : f32
    %197 = vector.broadcast %cst_95 : f32 to vector<2x1xf32>
    %198 = arith.maximumf %196, %197 : vector<2x1xf32>
    %199 = math.rsqrt %198 : vector<2x1xf32>
    %200 = vector.broadcast %199 : vector<2x1xf32> to vector<2x128xf32>
    %201 = arith.mulf %193, %200 : vector<2x128xf32>
    %c0_96 = arith.constant 0 : index
    %c0_97 = arith.constant 0 : index
    %202 = vector.load %arg4[%c0_96, %c0_97] : memref<2x768xbf16, #tpu.memory_space<vmem>>, vector<2x768xbf16>
    %c0_98 = arith.constant 0 : index
    %c0_99 = arith.constant 0 : index
    %203 = vector.load %arg5[%c0_98, %c0_99] : memref<768x128xbf16, #tpu.memory_space<vmem>>, vector<768x128xbf16>
    %cst_100 = arith.constant dense<0.000000e+00> : vector<2x128xf32>
    %204 = tpu.matmul %202, %203, %cst_100 {dimension_numbers = #tpu.dot_dimension_numbers<[1], [0], [0], [1], [0, 0, 1, 1], [], []>} : vector<2x768xbf16>, vector<768x128xbf16>, vector<2x128xf32> -> vector<2x128xf32>
    %205 = vector.broadcast %190 : vector<1x128xf32> to vector<2x128xf32>
    %206 = arith.addf %204, %205 : vector<2x128xf32>
    %207 = arith.mulf %206, %206 : vector<2x128xf32>
    %cst_101 = arith.constant dense<0.000000e+00> : vector<2xf32>
    %208 = vector.multi_reduction <add>, %207, %cst_101 [1] : vector<2x128xf32> to vector<2xf32>
    %209 = vector.shape_cast %208 : vector<2xf32> to vector<2x1xf32>
    %cst_102 = arith.constant 1.000000e-24 : f32
    %210 = vector.broadcast %cst_102 : f32 to vector<2x1xf32>
    %211 = arith.maximumf %209, %210 : vector<2x1xf32>
    %212 = math.rsqrt %211 : vector<2x1xf32>
    %213 = vector.broadcast %212 : vector<2x1xf32> to vector<2x128xf32>
    %214 = arith.mulf %206, %213 : vector<2x128xf32>
    %cst_103 = arith.constant dense<0.000000e+00> : vector<2x2xf32>
    %215 = tpu.matmul %201, %214, %cst_103 {dimension_numbers = #tpu.dot_dimension_numbers<[1], [1], [0], [0], [0, 0, 1, 0], [], []>} : vector<2x128xf32>, vector<2x128xf32>, vector<2x2xf32> -> vector<2x2xf32>
    %c0_104 = arith.constant 0 : index
    %c0_105 = arith.constant 0 : index
    %216 = vector.load %arg6[%c0_104, %c0_105] : memref<2x2xf32, #tpu.memory_space<vmem>>, vector<2x2xf32>
    tpu.vector_store %arg6[%c0_104, %c0_105], %215 {strides = array<i32>} : memref<2x2xf32, #tpu.memory_space<vmem>>, vector<2x2xf32>,
    return
  }
}

</mosaic_0001>

<bundles_post_ra>
// kernel: _lambda_.1
= control target key start
LH: loop header
LB: loop body
LE: loop exit
PB: predicated region body
PF: predicated region fallthrough
CT: control target
= control target key end

     0   :  { %11 = vsyncpa [#allocation6], 0  ;;  %s1974_s0 = inlined_call_operand.vmem [shape: f32[32,16], index: 0, kind: input, shape index: {}]   ;;  %s1975_s1 = inlined_call_operand.vmem [shape: f32[3,48,16], index: 1, kind: input, shape index: {}]   ;;  %s1976_s2 = inlined_call_operand.vmem [shape: f32[3,2,16], index: 2, kind: input, shape index: {}]   ;;  %s1977_s3 = inlined_call_operand.hbm [shape: f32[18,128], index: 3, kind: input, shape index: {}]   ;;  %s1978_s4 = inlined_call_operand.vmem [shape: bf16[2,768], index: 4, kind: input, shape index: {}]   ;;  %s1979_s5 = inlined_call_operand.hbm [shape: bf16[768,128], index: 5, kind: input, shape index: {}]   ;;  %s1980_s6 = inlined_call_operand.hbm [shape: f32[2,2], index: 6, kind: output, shape index: {}]  }
   0x1   :  { %12 = vsyncpa [#allocation9], 0 }
   0x2   :  { %13 = vsyncpa [#allocation7], 0  ;;  %s1717_s21 = smov [#allocation5]   ;;  %s1645_s25 = scalar_lea.hbm %s1977_s3, 384 }
   0x3   :  { %s25_s22 = sshll.u32 %s1717_s21, 4  ;;  %p1646_p0 = scmp.ne.s32.totalorder %s1977_s3, %s1645_s25  ;;  %s26_s22 = int_to_ptr.vmem [resolvable:$true] %s25_s22 }
   0x4   :  { %p1649_p1 = scmp.lt.u32.totalorder %s1645_s25, %s1977_s3 }
   0x6   :  { %p1651_p2 = pnand %p1649_p1, %p1646_p0 }
   0x8   :  { %1654 = shalt.err (!%p1651_p2)
}
   0x9   :  { %s1655_s30 = scalar_lea.vmem %s26_s22, 384  ;;  %p1660_p4 = scmp.lt.s32.totalorder %s26_s22, %s26_s22 }
   0xa   :  { %p1656_p3 = scmp.ne.s32.totalorder %s26_s22, %s1655_s30  ;;  %p1661_p5 = scmp.lt.s32.totalorder %s1655_s30, %s1655_s30 }
   0xc   :  { %p1662_p6 = por %p1661_p5, %p1660_p4 }
   0xe   :  { %p1663_p7 = pnand %p1662_p6, %p1656_p3 }
  0x10   :  { %1666 = shalt.err (!%p1663_p7)
}
  0x11   :  { %s1718_s7 = smov 128   ;;  %s1719_s8 = smov 8  }
  0x12   :  { %31 = dma.hbm_to_vmem [thread:$0]  %s1977_s3, 384, %s26_s22, [#allocation6], %s1718_s7, %s1718_s7, %s1719_s8  }
  0x13   :  { %s1720_s11 = smov [#allocation8]   ;;  %s1667_s15 = scalar_lea.hbm %s1979_s5, 6144 }
  0x14   :  { %s39_s12 = sshll.u32 %s1720_s11, 4  ;;  %p1668_p8 = scmp.ne.s32.totalorder %s1979_s5, %s1667_s15  ;;  %s40_s12 = int_to_ptr.vmem [resolvable:$true] %s39_s12 }
  0x15   :  { %p1671_p9 = scmp.lt.u32.totalorder %s1667_s15, %s1979_s5 }
  0x17   :  { %p1673_p10 = pnand %p1671_p9, %p1668_p8 }
  0x19   :  { %1676 = shalt.err (!%p1673_p10)
}
  0x1a   :  { %s1677_s20 = scalar_lea.vmem %s40_s12, 6144  ;;  %p1682_p12 = scmp.lt.s32.totalorder %s40_s12, %s40_s12 }
  0x1b   :  { %p1678_p11 = scmp.ne.s32.totalorder %s40_s12, %s1677_s20  ;;  %p1683_p13 = scmp.lt.s32.totalorder %s1677_s20, %s1677_s20 }
  0x1d   :  { %p1684_p0 = por %p1683_p13, %p1682_p12 }
  0x1f   :  { %p1685_p1 = pnand %p1684_p0, %p1678_p11 }
  0x21   :  { %1688 = shalt.err (!%p1685_p1)
}
  0x22   :  { %s1721_s3 = smov 64   ;;  %s1722_s21 = smov 4  }
  0x23   :  { %45 = dma.hbm_to_vmem [thread:$0]  %s1979_s5, 6144, %s40_s12, [#allocation9], %s1721_s3, %s1721_s3, %s1722_s21  }
  0x24   :  { %1711 = dma.done.wait [#allocation6], 384  }
  0x25   :  { %1712 = vsyncadd [#allocation6], 4294966912 }
  0x26   :  { %1713 = dma.done.wait [#allocation9], 6144  }
  0x27   :  { %1714 = vsyncadd [#allocation9], 4294961152  ;;  %v53_v0 = vld [vmem:[%s1974_s0] ss:$2 sm:$0xff]  ;;  %v1311_v1 = vld [vmem:[%s1974_s0 + $0x1] ss:$2 sm:$0xff]  ;;  %v69_v16 = vlaneseq }
  0x28   :  { %v1310_v2 = vld [vmem:[%s1974_s0 + $0x10] ss:$2 sm:$0xff]  ;;  %s1723_s30 = smov 16   ;;  %s1724_s5 = smov 32   ;;  %v1312_v3 = vld [vmem:[%s1974_s0 + $0x11] ss:$2 sm:$0xff] }
  0x29   :  { %106 = vrot.lane.b32.xlu0 %v53_v0, %s1723_s30  ;;  %112 = vrot.lane.b32.xlu1 %v1311_v1, %s1724_s5  ;;  %v124_v4 = vld [vmem:[%s1975_s1] sm:$0xff]  ;;  %v63_v5 = vrot.slane %v1311_v1, 7  ;;  %v64_v6 = vrot.slane %v1312_v3, 7  ;;  %v125_v7 = vld [vmem:[%s1975_s1 + $0x8] sm:$0xff]  ;;  %vm62_vm0 = vcmask 1040384   ;;  %v1824_v17 = vshrl.u32 %v69_v16, 7 }
  0x2a   :  { %v126_v8 = vld [vmem:[%s1975_s1 + $0x10] sm:$0xff]  ;;  %v127_v9 = vld [vmem:[%s1975_s1 + $0x18] sm:$0xff]  ;;  %v1540_v10 = vpack.c.bf16 %v125_v7, %v124_v4  ;;  %v128_v12 = vld [vmem:[%s1975_s1 + $0x20] sm:$0xff]  ;;  %vm118_vm2 = vcmask 130048   ;;  %vm121_vm3 = vcmask 261120   ;;  %vm130_vm5 = vcmask 392192  }
  0x2b   :  { %v1544_v11 = vpack.c.bf16 %v127_v9, %v126_v8  ;;  %v65_v13 = vsel %vm62_vm0, %v63_v5, %v64_v6  ;;  %v129_v14 = vld [vmem:[%s1975_s1 + $0x28] sm:$0xff]  ;;  %v76_v18 = vand.u32 7, %v1824_v17  ;;  %v71_v19 = vadd.s32 8, %v1824_v17  ;;  %v1317_v32 = vld [vmem:[%s1975_s1 + $0x30] sm:$0xff]  ;;  %v1318_v33 = vld [vmem:[%s1975_s1 + $0x38] sm:$0xff] }
  0x2c   :  { %1541 = vmatprep.subr.bf16.mxu0 %v1540_v10  ;;  %v1548_v15 = vpack.c.bf16 %v129_v14, %v128_v12  ;;  %v68_v20 = vsel %vm62_vm0, 0.0, %v63_v5  ;;  %v1319_v34 = vld [vmem:[%s1975_s1 + $0x40] sm:$0xff]  ;;  %v1725_v35 = vmov 0.0|0.0   ;;  %v1553_v36 = vpack.c.bf16 %v1318_v33, %v1317_v32  ;;  %v1320_v37 = vld [vmem:[%s1975_s1 + $0x48] sm:$0xff]  ;;  %v1321_v39 = vld [vmem:[%s1975_s1 + $0x50] sm:$0xff] }
  0x2d   :  { %108 = vrot.lane.b32.xlu0 %v1310_v2, %s1723_s30  ;;  %114 = vrot.lane.b32.xlu1 %v1312_v3, %s1724_s5  ;;  %vm96_vm1 = vcmp.eq.s32.totalorder %v76_v18, 0  ;;  %v83_v21 = vand.u32 7, %v71_v19  ;;  %v1556_v38 = vpack.c.bf16 %v1320_v37, %v1319_v34  ;;  %v1322_v40 = vld [vmem:[%s1975_s1 + $0x58] sm:$0xff]  ;;  %v1315_v6 = vld [vmem:[%s1976_s2] ss:$0 sm:$0xff]  ;;  %vm1726_vm6 = vmmov 0  }
  0x2e   :  { %1543 = vmatpush3.bf16.msra.mxu0 %v1540_v10  ;;  %v102_v22 = vsel %vm96_vm1, 0.0, %v68_v20  ;;  %1570 = vmatprep.subr.bf16.mxu1 %v1725_v35  ;;  %v1559_v41 = vpack.c.bf16 %v1322_v40, %v1321_v39  ;;  %v1316_v9 = vld [vmem:[%s1976_s2 + $0x1] ss:$0 sm:$0xff]  ;;  %v1727_v14 = vmov 0.0   ;;  %v1331_v32 = vld [vmem:[%s1975_s1 + $0x78] sm:$0xff]  ;;  %vm520_vm9 = vcmask 125952  }
  0x2f   :  { %1545 = vmatprep.subr.bf16.mxu0 %v1544_v11  ;;  %vm97_vm4 = vcmp.eq.s32.totalorder %v83_v21, 0  ;;  %1532 = vmatprep.mubr.msk.f32.mxu1 %vm1726_vm6, %v1727_v14  ;;  %v270_v21 = vand.u32 3, %v1824_v17  ;;  %v1332_v34 = vld [vmem:[%s1975_s1 + $0x80] sm:$0xff]  ;;  %vm645_vm10 = vcmask 1041408   ;;  %vm1292_vm11 = vcmask 9216  }
  0x30   :  { %v103_v27 = vsel %vm97_vm4, 0.0, %v65_v13 }
  0x31   :  { %vm278_vm7 = vcmp.eq.s32.totalorder %v270_v21, 0  ;;  %v1596_v21 = vld [vmem:[#allocation8 + $0xd0] sm:$0xff]  }
  0x32   :  { %1547 = vmatpush3.bf16.msra.mxu0 %v1544_v11 }
  0x33   :  { %1549 = vmatprep.subr.bf16.mxu0 %v1548_v15 }
  0x36   :  { %1551 = vmatpush3.bf16.msra.mxu0 %v1548_v15 }
  0x37   :  { %1552 = vmatprep.subr.bf16.mxu0 %v1725_v35 }
  0x9b   :  { %v107_v23 = vpop.permute.xlu0 %106  ;;  %v113_v24 = vpop.permute.xlu1 %112 }
  0x9c   :  { %v119_v25 = vsel %vm118_vm2, %v102_v22, %v107_v23 }
  0x9d   :  { %v122_v26 = vsel %vm121_vm3, %v119_v25, %v113_v24 }
  0x9e   :  { %1495 = vmatprep.mubr.msk.f32.mxu0 %vm130_vm5, %v122_v26 }
  0x9f   :  { %v109_v28 = vpop.permute.xlu0 %108  ;;  %v115_v29 = vpop.permute.xlu1 %114 }
  0xa0   :  { %v120_v30 = vsel %vm118_vm2, %v103_v27, %v109_v28  ;;  %v1328_v28 = vld [vmem:[%s1975_s1 + $0x60] sm:$0xff] }
  0xa1   :  { %v123_v31 = vsel %vm121_vm3, %v120_v30, %v115_v29  ;;  %v1329_v29 = vld [vmem:[%s1975_s1 + $0x68] sm:$0xff]  ;;  %v1330_v30 = vld [vmem:[%s1975_s1 + $0x70] sm:$0xff] }
  0xa2   :  { %1496 = vmatmul.mubr.msk.f32.vlgmr.msra.gmra.mrb[0].mxu0 %vm130_vm5, %v123_v31  ;;  %v1562_v31 = vpack.c.bf16 %v1329_v29, %v1328_v28  ;;  %v1565_v33 = vpack.c.bf16 %v1331_v32, %v1330_v30  ;;  %v1608_v29 = vld [vmem:[#allocation8 + $0xe8] sm:$0xff]  }
  0xa3   :  { %1554 = vmatpush3.bf16.msra.mxu0 %v1553_v36  ;;  %1510 = vmatprep.mubr.msk.f32.mxu0 %vm1726_vm6, %v1727_v14  ;;  %v1333_v36 = vld [vmem:[%s1975_s1 + $0x88] sm:$0xff]  ;;  %v1609_v30 = vld [vmem:[#allocation8 + $0xa8] sm:$0xff]  }
  0xa4   :  { %1555 = vmatprep.subr.bf16.mxu0 %v1725_v35  ;;  %v1568_v37 = vpack.c.bf16 %v1333_v36, %v1332_v34  ;;  %v652_v34 = vld [vmem:[%s1978_s4] sm:$0x3f] }
  0xa5   :  { %v1613_v36 = vld [vmem:[#allocation8 + $0xb0] sm:$0xff]  }
  0xa7   :  { %1557 = vmatpush3.bf16.msra.mxu0 %v1556_v38 }
  0xa8   :  { %1558 = vmatprep.subr.bf16.mxu0 %v1725_v35 }
  0xab   :  { %1560 = vmatpush3.bf16.msra.mxu0 %v1559_v41 }
  0xac   :  { %1561 = vmatprep.subr.bf16.mxu0 %v1725_v35 }
 0x175   :  { %v1497_v42 = vpop.f32.mrb[0].mxu0 }
 0x176   :  { %v213_v43 = vsel %vm118_vm2, %v1497_v42, 0.0  ;;  %v203_v44 = vpop.f32.mrb[1].mxu0 }
 0x177   :  { %v212_v45 = vsel %vm118_vm2, %v203_v44, 0.0 }
 0x178   :  { %v214_v46 = vadd.f32 %v213_v43, %v212_v45 }
 0x17a   :  { %v215_v47 = vrot.slane %v214_v46, 4 }
 0x17c   :  { %v216_v48 = vadd.f32 %v215_v47, %v214_v46 }
 0x17e   :  { %v217_v49 = vrot.slane %v216_v48, 2 }
 0x180   :  { %v218_v50 = vadd.f32 %v217_v49, %v216_v48 }
 0x182   :  { %v219_v51 = vrot.slane %v218_v50, 1 }
 0x184   :  { %v220_v52 = vadd.f32 %v219_v51, %v218_v50 }
 0x186   :  { %v222_v53 = vmul.f32 0.0625, %v220_v52 }
 0x188   :  { %v223_v54 = vsub.f32 %v203_v44, %v222_v53  ;;  %v224_v55 = vsub.f32 %v1497_v42, %v222_v53 }
 0x18a   :  { %v225_v56 = vmul.f32 %v223_v54, %v223_v54  ;;  %v226_v57 = vmul.f32 %v224_v55, %v224_v55 }
 0x18c   :  { %v227_v58 = vsel %vm118_vm2, %v225_v56, 0.0  ;;  %v228_v59 = vsel %vm118_vm2, %v226_v57, 0.0 }
 0x18d   :  { %v229_v60 = vadd.f32 %v228_v59, %v227_v58  ;;  %v1325_v59 = vld [vmem:[%s1976_s2 + $0x2] ss:$0 sm:$0xff] }
 0x18f   :  { %v230_v61 = vrot.slane %v229_v60, 4 }
 0x191   :  { %v231_v62 = vadd.f32 %v230_v61, %v229_v60  ;;  %v1327_v61 = vld [vmem:[%s1976_s2 + $0x3] ss:$0 sm:$0xff] }
 0x193   :  { %v232_v63 = vrot.slane %v231_v62, 2 }
 0x195   :  { %v233_v0 = vadd.f32 %v232_v63, %v231_v62 }
 0x197   :  { %v234_v1 = vrot.slane %v233_v0, 1 }
 0x199   :  { %v235_v2 = vadd.f32 %v234_v1, %v233_v0 }
 0x19b   :  { %v236_v3 = vmul.f32 0.0625, %v235_v2 }
 0x19d   :  { %v237_v4 = vadd.f32 1e-05, %v236_v3 }
 0x19f   :  { %1635 = vrsqrt.f32 %v237_v4  ;;  %v419_v4 = vand.u32 1, %v1824_v17 }
 0x1a1   :  { %vm427_vm8 = vcmp.eq.s32.totalorder %v419_v4, 0 }
 0x1a9   :  { %v1636_v5 = vpop.eup %1635 }
 0x1aa   :  { %v239_v7 = vmul.f32 %v1636_v5, %v223_v54  ;;  %v240_v8 = vmul.f32 %v1636_v5, %v224_v55 }
 0x1ac   :  { %v246_v10 = vmul.f32 %v1315_v6, %v239_v7  ;;  %v247_v11 = vmul.f32 %v1315_v6, %v240_v8 }
 0x1ae   :  { %v253_v12 = vadd.f32 %v1316_v9, %v246_v10  ;;  %v254_v13 = vadd.f32 %v1316_v9, %v247_v11  ;;  %v563_v11 = vld [vmem:[#allocation5] sm:$0xff] }
 0x1b0   :  { %v255_v15 = vmax.f32 %v253_v12, 0.0  ;;  %v256_v16 = vmax.f32 %v254_v13, 0.0  ;;  %v564_v12 = vld [vmem:[#allocation5 + $0x8] sm:$0xff]  ;;  %v1586_v13 = vld [vmem:[#allocation8 + $0x40] sm:$0xff]  }
 0x1b2   :  { %257 = vst.msk [vmem:[#allocation2] sm:$0xff] %vm118_vm2, %v255_v15  ;;  %258 = vst.msk [vmem:[#allocation2 + $0x8] sm:$0xff] %vm118_vm2, %v256_v16  ;;  %v1571_v15 = vpack.c.bf16 %v564_v12, %v563_v11  ;;  %v1588_v16 = vld [vmem:[#allocation8 + $0xc0] sm:$0xff]  }
 0x1b4   :  { %1572 = vmatpush3.bf16.msra.mxu1 %v1571_v15  ;;  %v1587_v15 = vld [vmem:[#allocation8] sm:$0xff]  }
 0x1b5   :  { %1415 = vmatprep.subr.bf16.mxu1 %v1586_v13 }
 0x1b9   :  { %v261_v18 = vld [vmem:[#allocation2 + $0x1] ss:$2 sm:$0xff]  ;;  %v259_v19 = vld [vmem:[#allocation2] ss:$2 sm:$0xff] }
 0x1ba   :  { %286 = vrot.lane.b32.xlu1 %v261_v18, %s1724_s5  ;;  %283 = vrot.lane.b32.xlu0 %v259_v19, %s1723_s30  ;;  %v263_v20 = vrot.slane %v261_v18, 7  ;;  %v1589_v18 = vld [vmem:[#allocation8 + $0x80] sm:$0xff]   ;;  %v1592_v19 = vld [vmem:[#allocation8 + $0xc8] sm:$0xff]  }
 0x1bc   :  { %v265_v22 = vsel %vm62_vm0, 0.0, %v263_v20  ;;  %v1593_v20 = vld [vmem:[#allocation8 + $0x88] sm:$0xff]  }
 0x1bd   :  { %v281_v24 = vsel %vm278_vm7, 0.0, %v265_v22  ;;  %v1597_v22 = vld [vmem:[#allocation8 + $0x90] sm:$0xff]  }
 0x22c   :  { %v287_v23 = vpop.permute.xlu1 %286  ;;  %v284_v25 = vpop.permute.xlu0 %283 }
 0x22d   :  { %v289_v26 = vsel %vm118_vm2, %v281_v24, %v284_v25  ;;  %v1601_v24 = vld [vmem:[#allocation8 + $0x98] sm:$0xff]   ;;  %v1604_v25 = vld [vmem:[#allocation8 + $0xe0] sm:$0xff]  }
 0x22e   :  { %v290_v27 = vsel %vm121_vm3, %v289_v26, %v287_v23  ;;  %v1600_v23 = vld [vmem:[#allocation8 + $0xd8] sm:$0xff]   ;;  %v1605_v26 = vld [vmem:[#allocation8 + $0xa0] sm:$0xff]  }
 0x22f   :  { %1511 = vmatmul.mubr.msk.f32.vlgmr.msra.gmra.mrb[2].mxu0 %vm130_vm5, %v290_v27  ;;  %v1728_v27 = vmov 1966171168  }
 0x230   :  { %1525 = vmatprep.mubr.msk.f32.mxu0 %vm1726_vm6, %v1727_v14  ;;  %1563 = vmatpush3.bf16.msra.mxu0 %v1562_v31  ;;  %v756_v28 = vunpack.c.l.s4 %v1728_v27  ;;  %v1607_v27 = vld [vmem:[#allocation8 + $0x28] sm:$0xff]  }
 0x231   :  { %1564 = vmatprep.subr.bf16.mxu0 %v1725_v35 }
 0x232   :  { %v757_v31 = vunpack.c.0.s8 %v756_v28  ;;  %v1610_v28 = vld [vmem:[#allocation8 + $0x70] sm:$0xff]  }
 0x234   :  { %1566 = vmatpush3.bf16.msra.mxu0 %v1565_v33  ;;  %v1920_v32 = vsub.s32 %v757_v31, %v1824_v17  ;;  %v1612_v33 = vld [vmem:[#allocation8 + $0xf0] sm:$0xff]   ;;  %v1615_v31 = vld [vmem:[#allocation8 + $0x38] sm:$0xff]  }
 0x235   :  { %1567 = vmatprep.subr.bf16.mxu0 %v1725_v35 }
 0x238   :  { %1569 = vmatpush3.bf16.msra.mxu0 %v1568_v37  ;;  %v761_v37 = vrot.slane %v652_v34, %v1920_v32 }
 0x239   :  { %1437 = vmatprep.subr.bf16.mxu0 %v1588_v16 }
 0x302   :  { %v367_v38 = vpop.f32.mrb[2].mxu0 }
 0x303   :  { %v371_v39 = vsel %vm118_vm2, %v367_v38, 0.0  ;;  %v1512_v40 = vpop.f32.mrb[3].mxu0 }
 0x304   :  { %v372_v41 = vrot.slane %v371_v39, 4 }
 0x306   :  { %v373_v42 = vadd.f32 %v372_v41, %v371_v39  ;;  %v1616_v39 = vld [vmem:[#allocation8 + $0xf8] sm:$0xff]  }
 0x307   :  { %v1617_v41 = vld [vmem:[#allocation8 + $0xb8] sm:$0xff]  }
 0x308   :  { %v374_v43 = vrot.slane %v373_v42, 2 }
 0x30a   :  { %v375_v44 = vadd.f32 %v374_v43, %v373_v42  ;;  %v1928_v42 = vrot.slane %v761_v37, %v1920_v32 }
 0x30c   :  { %v376_v45 = vrot.slane %v375_v44, 1  ;;  %v799_v43 = vcombine.high %v1928_v42, %v1928_v42 }
 0x30e   :  { %v377_v46 = vadd.f32 %v376_v45, %v375_v44  ;;  %v754_v44 = vcombine.high %v652_v34, %v652_v34  ;;  %v1619_v34 = vld [vmem:[#allocation8 + $0x100] sm:$0xff]  }
 0x310   :  { %v379_v47 = vmul.f32 0.125, %v377_v46  ;;  %v1936_v45 = vrot.slane %v754_v44, %v1920_v32  ;;  %v1628_v44 = vld [vmem:[#allocation8 + $0x168] sm:$0xff]  }
 0x312   :  { %v380_v48 = vsub.f32 %v367_v38, %v379_v47  ;;  %v769_v38 = vcombine.high %v761_v37, %v761_v37  ;;  %v770_v46 = vcombine.high %v1936_v45, %v1936_v45  ;;  %v1621_v37 = vld [vmem:[#allocation8 + $0x108] sm:$0xff]  }
 0x314   :  { %v381_v49 = vmul.f32 %v380_v48, %v380_v48  ;;  %v791_v40 = vrot.slane %v769_v38, %v1920_v32  ;;  %v1622_v38 = vld [vmem:[#allocation8 + $0x150] sm:$0xff]  }
 0x316   :  { %v382_v50 = vsel %vm118_vm2, %v381_v49, 0.0  ;;  %v800_v17 = vcombine.high %v791_v40, %v791_v40 }
 0x317   :  { %v383_v51 = vrot.slane %v382_v50, 4 }
 0x319   :  { %v384_v52 = vadd.f32 %v383_v51, %v382_v50  ;;  %v1942_v50 = vrot.slane %v770_v46, %v1920_v32  ;;  %v784_v51 = vrot.slane %v1936_v45, %v1920_v32  ;;  %v1630_v46 = vld [vmem:[#allocation8 + $0x170] sm:$0xff]  }
 0x31b   :  { %v385_v53 = vrot.slane %v384_v52, 2 }
 0x31d   :  { %v386_v35 = vadd.f32 %v385_v53, %v384_v52 }
 0x31f   :  { %v387_v54 = vrot.slane %v386_v35, 1 }
 0x321   :  { %v388_v55 = vadd.f32 %v387_v54, %v386_v35 }
 0x323   :  { %v389_v56 = vmul.f32 0.125, %v388_v55 }
 0x325   :  { %v390_v57 = vadd.f32 1e-05, %v389_v56 }
 0x327   :  { %1637 = vrsqrt.f32 %v390_v57 }
 0x331   :  { %v1638_v58 = vpop.eup %1637 }
 0x332   :  { %v392_v60 = vmul.f32 %v1638_v58, %v380_v48 }
 0x334   :  { %v399_v62 = vmul.f32 %v1325_v59, %v392_v60 }
 0x336   :  { %v405_v63 = vadd.f32 %v1327_v61, %v399_v62 }
 0x338   :  { %v406_v0 = vmax.f32 %v405_v63, 0.0 }
 0x33a   :  { %407 = vst.msk [vmem:[#allocation3] sm:$0xff] %vm118_vm2, %v406_v0 }
 0x341   :  { %v410_v1 = vld [vmem:[#allocation3 + $0x1] ss:$2 sm:$0xf]  ;;  %v408_v2 = vld [vmem:[#allocation3] ss:$2 sm:$0xf] }
 0x342   :  { %435 = vrot.lane.b32.xlu1 %v410_v1, %s1724_s5  ;;  %432 = vrot.lane.b32.xlu0 %v408_v2, %s1723_s30  ;;  %v412_v3 = vrot.slane %v410_v1, 7 }
 0x344   :  { %v414_v5 = vsel %vm62_vm0, 0.0, %v412_v3 }
 0x345   :  { %v430_v7 = vsel %vm427_vm8, 0.0, %v414_v5  ;;  %v1336_v5 = vld [vmem:[%s1976_s2 + $0x4] ss:$0 sm:$0xff] }
 0x3b4   :  { %v436_v6 = vpop.permute.xlu1 %435  ;;  %v433_v8 = vpop.permute.xlu0 %432 }
 0x3b5   :  { %v438_v9 = vsel %vm118_vm2, %v430_v7, %v433_v8  ;;  %v1338_v7 = vld [vmem:[%s1976_s2 + $0x5] ss:$0 sm:$0xff]  ;;  %s1729_s2 = smov [#allocation10]  }
 0x3b6   :  { %v439_v10 = vsel %vm121_vm3, %v438_v9, %v436_v6  ;;  %s1300_s28 = sshll.u32 %s1729_s2, 4  ;;  %s1301_s28 = int_to_ptr.vmem [resolvable:$true] %s1300_s28 }
 0x3b7   :  { %1526 = vmatmul.mubr.msk.f32.vlgmr.msra.gmra.mrb[4].mxu0 %vm130_vm5, %v439_v10  ;;  %s1689_s29 = scalar_lea.vmem %s1301_s28, 32  ;;  %p1694_p3 = scmp.lt.s32.totalorder %s1301_s28, %s1301_s28 }
 0x3b8   :  { %1438 = vmatpush3.bf16.msra.mxu0 %v1589_v18  ;;  %1167 = vmatprep.mubr.bf16.mxu0 %v800_v17  ;;  %v1590_v18 = vld [vmem:[#allocation8 + $0x48] sm:$0xff]   ;;  %v1626_v17 = vld [vmem:[#allocation8 + $0x160] sm:$0xff]   ;;  %p1690_p2 = scmp.ne.s32.totalorder %s1301_s28, %s1689_s29  ;;  %p1695_p4 = scmp.lt.s32.totalorder %s1689_s29, %s1689_s29 }
 0x3b9   :  { %1439 = vmatprep.subr.bf16.mxu0 %v1592_v19  ;;  %v1591_v19 = vld [vmem:[#allocation8 + $0x8] sm:$0xff]  }
 0x3ba   :  { %p1696_p5 = por %p1695_p4, %p1694_p3 }
 0x3bc   :  { %1440 = vmatpush3.bf16.msra.mxu0 %v1593_v20  ;;  %v1594_v20 = vld [vmem:[#allocation8 + $0x50] sm:$0xff]   ;;  %p1697_p6 = pnand %p1696_p5, %p1690_p2 }
 0x3bd   :  { %1441 = vmatprep.subr.bf16.mxu0 %v1596_v21  ;;  %v1595_v21 = vld [vmem:[#allocation8 + $0x10] sm:$0xff]  }
 0x3c0   :  { %1442 = vmatpush3.bf16.msra.mxu0 %v1597_v22  ;;  %v1598_v22 = vld [vmem:[#allocation8 + $0x58] sm:$0xff]  }
 0x3c1   :  { %1443 = vmatprep.subr.bf16.mxu0 %v1600_v23  ;;  %v1599_v23 = vld [vmem:[#allocation8 + $0x18] sm:$0xff]  }
 0x3c4   :  { %1444 = vmatpush3.bf16.msra.mxu0 %v1601_v24  ;;  %v1602_v24 = vld [vmem:[#allocation8 + $0x60] sm:$0xff]  }
 0x3c5   :  { %1445 = vmatprep.subr.bf16.mxu0 %v1604_v25  ;;  %v1603_v25 = vld [vmem:[#allocation8 + $0x20] sm:$0xff]  }
 0x3c8   :  { %1446 = vmatpush3.bf16.msra.mxu0 %v1605_v26  ;;  %v1606_v26 = vld [vmem:[#allocation8 + $0x68] sm:$0xff]  }
 0x3c9   :  { %1447 = vmatprep.subr.bf16.mxu0 %v1608_v29  ;;  %v1611_v29 = vld [vmem:[#allocation8 + $0x30] sm:$0xff]  }
 0x3cc   :  { %1448 = vmatpush3.bf16.msra.mxu0 %v1609_v30  ;;  %v1614_v30 = vld [vmem:[#allocation8 + $0x78] sm:$0xff]  }
 0x3cd   :  { %1449 = vmatprep.subr.bf16.mxu0 %v1612_v33  ;;  %v1618_v33 = vld [vmem:[#allocation8 + $0x140] sm:$0xff]  }
 0x3d0   :  { %1450 = vmatpush3.bf16.msra.mxu0 %v1613_v36  ;;  %v1620_v36 = vld [vmem:[#allocation8 + $0x148] sm:$0xff]  }
 0x3d1   :  { %1451 = vmatprep.subr.bf16.mxu0 %v1616_v39  ;;  %v1623_v39 = vld [vmem:[#allocation8 + $0x110] sm:$0xff]  }
 0x3d4   :  { %1452 = vmatpush3.bf16.msra.mxu0 %v1617_v41  ;;  %v1625_v41 = vld [vmem:[#allocation8 + $0x118] sm:$0xff]  }
 0x3d5   :  { %1535 = vmatprep.subr.mxu0 %v1727_v14 }
 0x3d7   :  { %1168 = vmatmul.mubr.bf16.vlgmr.msra.gmra.mrb[8].mxu0 %v799_v43  ;;  %v1627_v43 = vld [vmem:[#allocation8 + $0x120] sm:$0xff]  }
 0x3d8   :  { %1537 = vmatprep.mubr.msk.f32.mxu0 %vm1726_vm6, %v1727_v14 }
 0x48a   :  { %v516_v47 = vpop.f32.mrb[4].mxu0 }
 0x48b   :  { %v521_v48 = vsel %vm520_vm9, %v516_v47, 0.0  ;;  %v1527_v49 = vpop.f32.mrb[5].mxu0 }
 0x48c   :  { %v522_v52 = vrot.slane %v521_v48, 4  ;;  %v1633_v49 = vld [vmem:[#allocation8 + $0x138] sm:$0xff]  }
 0x48e   :  { %v523_v14 = vadd.f32 %v522_v52, %v521_v48  ;;  %v1632_v48 = vld [vmem:[#allocation8 + $0x178] sm:$0xff]  }
 0x490   :  { %v524_v53 = vrot.slane %v523_v14, 2 }
 0x492   :  { %v525_v35 = vadd.f32 %v524_v53, %v523_v14 }
 0x494   :  { %v526_v54 = vrot.slane %v525_v35, 1 }
 0x496   :  { %v527_v55 = vadd.f32 %v526_v54, %v525_v35  ;;  %v1339_v54 = vld [vmem:[#allocation5 + $0x10] ss:$0 sm:$0xff] }
 0x498   :  { %v529_v56 = vmul.f32 0.25, %v527_v55 }
 0x49a   :  { %v530_v57 = vsub.f32 %v516_v47, %v529_v56  ;;  %v1631_v47 = vld [vmem:[#allocation8 + $0x130] sm:$0xff]  }
 0x49c   :  { %v531_v58 = vmul.f32 %v530_v57, %v530_v57 }
 0x49e   :  { %v532_v59 = vsel %vm520_vm9, %v531_v58, 0.0 }
 0x49f   :  { %v533_v60 = vrot.slane %v532_v59, 4 }
 0x4a1   :  { %v534_v61 = vadd.f32 %v533_v60, %v532_v59 }
 0x4a3   :  { %v535_v62 = vrot.slane %v534_v61, 2 }
 0x4a5   :  { %v536_v63 = vadd.f32 %v535_v62, %v534_v61  ;;  %v1341_v61 = vld [vmem:[#allocation5 + $0x11] ss:$0 sm:$0xff] }
 0x4a7   :  { %v537_v0 = vrot.slane %v536_v63, 1 }
 0x4a9   :  { %v538_v1 = vadd.f32 %v537_v0, %v536_v63 }
 0x4ab   :  { %v539_v2 = vmul.f32 0.25, %v538_v1 }
 0x4ad   :  { %v540_v3 = vadd.f32 1e-05, %v539_v2 }
 0x4af   :  { %1639 = vrsqrt.f32 %v540_v3 }
 0x4b9   :  { %v1640_v4 = vpop.eup %1639 }
 0x4ba   :  { %v542_v6 = vmul.f32 %v1640_v4, %v530_v57 }
 0x4bc   :  { %v549_v8 = vmul.f32 %v1336_v5, %v542_v6 }
 0x4be   :  { %v555_v9 = vadd.f32 %v1338_v7, %v549_v8 }
 0x4c0   :  { %v556_v10 = vmax.f32 %v555_v9, 0.0 }
 0x4c2   :  { %557 = vst.msk [vmem:[#allocation4] sm:$0xf] %vm520_vm9, %v556_v10 }
 0x4c9   :  { %v558_v11 = vld [vmem:[#allocation4] ss:$2 sm:$0x3]  ;;  %v560_v12 = vld [vmem:[#allocation4 + $0x1] ss:$2 sm:$0x3] }
 0x4ca   :  { %v561_v13 = vadd.f32 %v560_v12, %v558_v11 }
 0x4cc   :  { %v562_v16 = vmul.f32 0.5, %v561_v13 }
 0x4ce   :  { %1533 = vmatmul.mubr.msk.f32.vlgmr.msra.gmra.mrb[0].mxu1 %vm118_vm2, %v562_v16 }
 0x4cf   :  { %1416 = vmatpush3.bf16.msra.mxu1 %v1587_v15  ;;  %1127 = vmatprep.mubr.bf16.mxu1 %v791_v40  ;;  %v1624_v40 = vld [vmem:[#allocation8 + $0x158] sm:$0xff]  }
 0x4d0   :  { %1417 = vmatprep.subr.bf16.mxu1 %v1590_v18 }
 0x4d3   :  { %1418 = vmatpush3.bf16.msra.mxu1 %v1591_v19 }
 0x4d4   :  { %1419 = vmatprep.subr.bf16.mxu1 %v1594_v20 }
 0x4d7   :  { %1420 = vmatpush3.bf16.msra.mxu1 %v1595_v21 }
 0x4d8   :  { %1421 = vmatprep.subr.bf16.mxu1 %v1598_v22 }
 0x4db   :  { %1422 = vmatpush3.bf16.msra.mxu1 %v1599_v23 }
 0x4dc   :  { %1423 = vmatprep.subr.bf16.mxu1 %v1602_v24 }
 0x4df   :  { %1424 = vmatpush3.bf16.msra.mxu1 %v1603_v25 }
 0x4e0   :  { %1425 = vmatprep.subr.bf16.mxu1 %v1606_v26 }
 0x4e3   :  { %1426 = vmatpush3.bf16.msra.mxu1 %v1607_v27 }
 0x4e4   :  { %1427 = vmatprep.subr.bf16.mxu1 %v1610_v28 }
 0x4e7   :  { %1428 = vmatpush3.bf16.msra.mxu1 %v1611_v29 }
 0x4e8   :  { %1429 = vmatprep.subr.bf16.mxu1 %v1614_v30 }
 0x4eb   :  { %1430 = vmatpush3.bf16.msra.mxu1 %v1615_v31 }
 0x4ec   :  { %1459 = vmatprep.subr.bf16.mxu1 %v1618_v33 }
 0x4ee   :  { %1128 = vmatmul.mubr.bf16.vlgmr.msra.gmra.mrb[4].mxu1 %v1928_v42  ;;  %v1629_v42 = vld [vmem:[#allocation8 + $0x128] sm:$0xff]  }
 0x4ef   :  { %1460 = vmatpush3.bf16.msra.mxu1 %v1619_v34  ;;  %1207 = vmatprep.mubr.bf16.mxu1 %v1942_v50  ;;  %v1453_v50 = vpop.f32.mrb[8].mxu0 }
 0x4f0   :  { %1461 = vmatprep.subr.bf16.mxu1 %v1620_v36  ;;  %v1454_v52 = vpop.f32.mrb[9].mxu0 }
 0x4f1   :  { %v1455_v14 = vadd.f32 %v1454_v52, %v1453_v50  ;;  %v1456_v53 = vpop.f32.mrb[10].mxu0 }
 0x4f2   :  { %v1457_v35 = vpop.f32.mrb[11].mxu0 }
 0x4f3   :  { %1462 = vmatpush3.bf16.msra.mxu1 %v1621_v37 }
 0x4f4   :  { %1463 = vmatprep.subr.bf16.mxu1 %v1622_v38 }
 0x4f7   :  { %1464 = vmatpush3.bf16.msra.mxu1 %v1623_v39 }
 0x4f8   :  { %1465 = vmatprep.subr.bf16.mxu1 %v1624_v40 }
 0x4fb   :  { %1466 = vmatpush3.bf16.msra.mxu1 %v1625_v41 }
 0x4fc   :  { %1467 = vmatprep.subr.bf16.mxu1 %v1626_v17 }
 0x4ff   :  { %1468 = vmatpush3.bf16.msra.mxu1 %v1627_v43 }
 0x500   :  { %1469 = vmatprep.subr.bf16.mxu1 %v1628_v44 }
 0x503   :  { %1470 = vmatpush3.bf16.msra.mxu1 %v1629_v42 }
 0x504   :  { %1471 = vmatprep.subr.bf16.mxu1 %v1630_v46 }
 0x507   :  { %1472 = vmatpush3.bf16.msra.mxu1 %v1631_v47 }
 0x508   :  { %1473 = vmatprep.subr.bf16.mxu1 %v1632_v48 }
 0x50b   :  { %1474 = vmatpush3.bf16.msra.mxu1 %v1633_v49 }
 0x50e   :  { %1208 = vmatmul.mubr.bf16.vlgmr.msra.gmra.mrb[8].mxu1 %v784_v51 }
 0x5a1   :  { %v640_v55 = vpop.f32.mrb[0].mxu1 }
 0x5a2   :  { %v641_v56 = vadd.f32 %v1339_v54, %v640_v55  ;;  %v1534_v57 = vpop.f32.mrb[1].mxu1 }
 0x5a4   :  { %v644_v58 = vmul.f32 %v641_v56, %v641_v56 }
 0x5a6   :  { %v646_v59 = vsel %vm645_vm10, %v644_v58, 0.0 }
 0x5a7   :  { %647 = vadd.xlane.f32.xlu1 %v646_v59 }
 0x5c1   :  { %v1431_v60 = vpop.f32.mrb[4].mxu1 }
 0x5c2   :  { %v1432_v62 = vpop.f32.mrb[5].mxu1 }
 0x5c3   :  { %v1433_v63 = vadd.f32 %v1432_v62, %v1431_v60  ;;  %v1434_v32 = vpop.f32.mrb[6].mxu1 }
 0x5c4   :  { %v1435_v45 = vpop.f32.mrb[7].mxu1 }
 0x5c5   :  { %v1130_v51 = vadd.f32 %v1433_v63, %v1341_v61 }
 0x5c7   :  { %v1170_v0 = vadd.f32 %v1455_v14, %v1130_v51 }
 0x5e1   :  { %v1475_v1 = vpop.f32.mrb[8].mxu1 }
 0x5e2   :  { %v1476_v2 = vpop.f32.mrb[9].mxu1 }
 0x5e3   :  { %v1477_v3 = vadd.f32 %v1476_v2, %v1475_v1  ;;  %v1478_v4 = vpop.f32.mrb[10].mxu1 }
 0x5e4   :  { %v1479_v5 = vpop.f32.mrb[11].mxu1 }
 0x5e5   :  { %v1210_v6 = vadd.f32 %v1477_v3, %v1170_v0 }
 0x5e7   :  { %v1215_v7 = vmul.f32 %v1210_v6, %v1210_v6 }
 0x5e9   :  { %v1216_v8 = vsel %vm645_vm10, %v1215_v7, 0.0 }
 0x5ea   :  { %1217 = vadd.xlane.f32.xlu0 %v1216_v8 }
 0x634   :  { %v648_v9 = vpop.xlane.xlu1 %647 }
 0x635   :  { %v649_v10 = vmax.f32 %v648_v9, 1e-24 }
 0x677   :  { %v1218_v11 = vpop.xlane.xlu0 %1217 }
 0x678   :  { %v1219_v12 = vmax.f32 %v1218_v11, 1e-24 }
 0x67a   :  { %1641 = vrsqrt.f32 %v1219_v12 }
 0x67b   :  { %1643 = vrsqrt.f32 %v649_v10 }
 0x684   :  { %v1642_v13 = vpop.eup %1641 }
 0x685   :  { %v1644_v15 = vpop.eup %1643  ;;  %v1221_v16 = vmul.f32 %v1642_v13, %v1210_v6 }
 0x686   :  { %v651_v18 = vmul.f32 %v1644_v15, %v641_v56 }
 0x687   :  { %1536 = vmatpush3.xpose.msra.mxu0 %v1221_v16 }
 0x68a   :  { %1538 = vmatmul.mubr.f32.vlgmr.msra.gmra.mrb[6].mxu0 %v651_v18 }
 0x75d   :  { %v1288_v19 = vpop.f32.mrb[6].mxu0 }
 0x75e   :  { %v1539_v20 = vpop.f32.mrb[7].mxu0  ;;  %1293 = vst.msk [vmem:[#allocation10] sm:$0x3] %vm1292_vm11, %v1288_v19 }
 0x75f   :  { %1700 = shalt.err (!%p1697_p6)
}
 0x760   :  { %s1701_s9 = scalar_lea.hbm %s1980_s6, 32 }
 0x761   :  { %p1702_p7 = scmp.ne.s32.totalorder %s1980_s6, %s1701_s9  ;;  %p1705_p8 = scmp.lt.u32.totalorder %s1701_s9, %s1980_s6 }
 0x763   :  { %p1707_p9 = pnand %p1705_p8, %p1702_p7 }
 0x765   :  { %1710 = shalt.err (!%p1707_p9)
}
 0x766   :  { %1303 = dma.vmem_to_hbm [thread:$0]  %s1301_s28, 32, %s1980_s6, [#allocation7]  }
 0x767   :  { %1715 = dma.done.wait [#allocation7], 32  }
 0x768   :  { %1716 = vsyncadd [#allocation7], 4294967264 }
 0x769   :  { %1307 = vsyncpa [#allocation6], 1 }
 0x76a   :  { %1308 = vsyncpa [#allocation9], 1 }
 0x76b   :  { %1309 = vsyncpa [#allocation7], 1 }

</bundles_post_ra>
